<compile_context>
chip_gen: v5e
topology: v5e:2x2
jax: 0.10.0
libtpu: 0.0.40
codegen_flags: <defaults>
</compile_context>

<pallas_src>
import functools

import jax
import jax.numpy as jnp
from jax.experimental import pallas as pl
from jax.experimental.pallas import tpu as pltpu

BN_EPS = 1e-5
H1, H2 = 64, 32
LANE = 128          # lane width; classes + hidden dims are zero-padded to this
NEG_INF = -1e30


def _round_up(x, m):
    return ((x + m - 1) // m) * m


# -----------------------------------------------------------------------------
# Kernel: per batch-tile -> 3 matmuls (+bias, ReLU on the first two), softmax
# over the 128 class lanes (padded lanes are pre-masked to NEG_INF via the bias).
# -----------------------------------------------------------------------------
def wine_classifier_kernel(x_ref, w1_ref, w2_ref, w3_ref, bias_ref, out_ref):
    x = x_ref[...]                      # [TB, F]  (un-padded feature dim)

    b1 = bias_ref[0:1, :]               # [1, 128] zeros beyond H1
    b2 = bias_ref[1:2, :]               # [1, 128] zeros beyond H2
    b3 = bias_ref[2:3, :]               # [1, 128] NEG_INF beyond num_classes

    # Layer 1: Linear (+ folded BatchNorm) + ReLU.  Dropout(0.3) = identity (eval).
    h = jnp.dot(x, w1_ref[...], preferred_element_type=jnp.float32) + b1
    h = jnp.maximum(h, 0.0)

    # Layer 2: Linear (+ folded BatchNorm) + ReLU.  Dropout(0.3) = identity (eval).
    h = jnp.dot(h, w2_ref[...], preferred_element_type=jnp.float32) + b2
    h = jnp.maximum(h, 0.0)

    # Layer 3: Linear; the class-lane mask is already baked into b3.
    logits = jnp.dot(h, w3_ref[...], preferred_element_type=jnp.float32) + b3

    m = jnp.max(logits, axis=1, keepdims=True)
    e = jnp.exp(logits - m)             # masked lanes -> exactly 0.0
    denom = jnp.sum(e, axis=1, keepdims=True)
    out_ref[...] = e / denom            # exact divide (approx recip broke 1e-4 sums)


# -----------------------------------------------------------------------------
# Param preparation (host/JAX side, once): fold BN, pad hidden/class dims,
# pack biases + softmax mask into a single (8, 128) tile.
# -----------------------------------------------------------------------------
def prepare_params(params, input_size, num_classes):
    assert num_classes <= LANE, "bias/mask packing assumes num_classes <= 128"

    # BatchNorm1d (inference) is a per-channel affine -> fold into the Linear.
    s1 = params["g1"] * jax.lax.rsqrt(params["rv1"] + BN_EPS)   # [1, 64]
    s2 = params["g2"] * jax.lax.rsqrt(params["rv2"] + BN_EPS)   # [1, 32]

    w1 = params["w1"] * s1                                       # [F, 64]
    b1 = (params["b1"] - params["rm1"]) * s1 + params["be1"]     # [1, 64]
    w2 = params["w2"] * s2                                       # [64, 32]
    b2 = (params["b2"] - params["rm2"]) * s2 + params["be2"]     # [1, 32]
    w3 = params["w3"]                                            # [32, C]
    b3 = params["b3"]                                            # [1, C]

    # Zero-pad hidden/class dims to one full 128-lane slab (exact: padded weight
    # rows/cols are 0, padded b1/b2 lanes are 0 so ReLU keeps them at 0).
    w1p = jnp.zeros((input_size, LANE), jnp.float32).at[:, :H1].set(w1)
    w2p = jnp.zeros((LANE, LANE), jnp.float32).at[:H1, :H2].set(w2)
    w3p = jnp.zeros((LANE, LANE), jnp.float32).at[:H2, :num_classes].set(w3)

    # One (8, 128) tile: row0 = b1, row1 = b2, row2 = b3 with NEG_INF on the
    # padded class lanes (this IS the softmax mask, applied for free via +bias).
    bias = jnp.zeros((8, LANE), jnp.float32)
    bias = bias.at[0, :H1].set(b1[0])
    bias = bias.at[1, :H2].set(b2[0])
    row2 = jnp.full((LANE,), NEG_INF, jnp.float32).at[:num_classes].set(b3[0])
    bias = bias.at[2, :].set(row2)

    return dict(w1=w1p, w2=w2p, w3=w3p, bias=bias,
                input_size=input_size, num_classes=num_classes)


# -----------------------------------------------------------------------------
# Forward wrapper: batch grid with right-sized tiles, VMEM-resident weights,
# un-padded feature input, lane-dense (128) output sliced back to num_classes.
# -----------------------------------------------------------------------------
def wine_classifier_forward(x, prep, *, max_block_b=2048, min_steps=1):
    B, F = x.shape
    assert F == prep["input_size"]
    num_classes = prep["num_classes"]

    # Right-size the batch tile: fewest steps that keep tb <= max_block_b, then
    # tb = round_up(cdiv(B, n_steps), 8)  ->  <8 rows of padding per step.
    # min_steps >= 2 lets v7x shard the (parallel) batch axis over both TCs.
    n_steps = max(min_steps, pl.cdiv(B, max_block_b))
    tb = _round_up(pl.cdiv(B, n_steps), 8)
    grid_b = pl.cdiv(B, tb)
    b_pad = grid_b * tb

    # No feature-lane padding; pad only the batch dim (skipped if it divides).
    xp = x if b_pad == B else jnp.pad(x, ((0, b_pad - B), (0, 0)))

    out = pl.pallas_call(
        wine_classifier_kernel,
        out_shape=jax.ShapeDtypeStruct((b_pad, LANE), jnp.float32),
        grid_spec=pltpu.PrefetchScalarGridSpec(
            num_scalar_prefetch=0,
            grid=(grid_b,),
            in_specs=[
                pl.BlockSpec((tb, F), lambda i: (i, 0)),            # x tile, full K
                pl.BlockSpec(prep["w1"].shape, lambda i: (0, 0)),    # resident
                pl.BlockSpec(prep["w2"].shape, lambda i: (0, 0)),    # resident
                pl.BlockSpec(prep["w3"].shape, lambda i: (0, 0)),    # resident
                pl.BlockSpec(prep["bias"].shape, lambda i: (0, 0)),  # resident
            ],
            out_specs=pl.BlockSpec((tb, LANE), lambda i: (i, 0)),
        ),
        compiler_params=pltpu.CompilerParams(
            dimension_semantics=("parallel",),
            vmem_limit_bytes=32 << 20,   # headroom if tb is raised on v5e (16 MiB default)
        ),
    )(xp, prep["w1"], prep["w2"], prep["w3"], prep["bias"])

    return out[:B, :num_classes]


# -----------------------------------------------------------------------------
# Init (PyTorch-default-like Linear init, fresh BatchNorm stats) + pure-JAX ref.
# -----------------------------------------------------------------------------
def init_params(key, input_size, num_classes):
    def linear(key, fan_in, fan_out):
        kw, kb = jax.random.split(key)
        bound = 1.0 / jnp.sqrt(fan_in)
        w = jax.random.uniform(kw, (fan_in, fan_out), jnp.float32, -bound, bound)
        b = jax.random.uniform(kb, (1, fan_out), jnp.float32, -bound, bound)
        return w, b

    def bn(n):
        return (jnp.ones((1, n), jnp.float32),     # gamma
                jnp.zeros((1, n), jnp.float32),    # beta
                jnp.zeros((1, n), jnp.float32),    # running_mean
                jnp.ones((1, n), jnp.float32))     # running_var

    k1, k2, k3 = jax.random.split(key, 3)
    w1, b1 = linear(k1, input_size, H1)
    w2, b2 = linear(k2, H1, H2)
    w3, b3 = linear(k3, H2, num_classes)
    g1, be1, rm1, rv1 = bn(H1)
    g2, be2, rm2, rv2 = bn(H2)
    return dict(w1=w1, b1=b1, g1=g1, be1=be1, rm1=rm1, rv1=rv1,
                w2=w2, b2=b2, g2=g2, be2=be2, rm2=rm2, rv2=rv2,
                w3=w3, b3=b3)


def reference_forward(x, p):
    hp = jax.lax.Precision.HIGHEST
    h = jnp.dot(x, p["w1"], precision=hp) + p["b1"]
    h = (h - p["rm1"]) / jnp.sqrt(p["rv1"] + BN_EPS) * p["g1"] + p["be1"]
    h = jnp.maximum(h, 0.0)
    h = jnp.dot(h, p["w2"], precision=hp) + p["b2"]
    h = (h - p["rm2"]) / jnp.sqrt(p["rv2"] + BN_EPS) * p["g2"] + p["be2"]
    h = jnp.maximum(h, 0.0)
    logits = jnp.dot(h, p["w3"], precision=hp) + p["b3"]
    return jax.nn.softmax(logits, axis=1)


if __name__ == "__main__":
    # Wine-dataset-like shapes: 13 features, 3 classes.
    INPUT_SIZE, NUM_CLASSES = 13, 3
    key = jax.random.PRNGKey(0)
    kx, kp, kx2 = jax.random.split(key, 3)

    params = init_params(kp, INPUT_SIZE, NUM_CLASSES)
    prep = prepare_params(params, INPUT_SIZE, NUM_CLASSES)

    # Small batch (single grid step, no batch padding).
    B = 8
    x = jax.random.normal(kx, (B, INPUT_SIZE), jnp.float32)
    out = jax.block_until_ready(wine_classifier_forward(x, prep))
    ref = reference_forward(x, params)
    assert out.shape == (B, NUM_CLASSES)
    assert jnp.allclose(jnp.sum(out, axis=1), 1.0, atol=1e-4)
    assert jnp.allclose(out, ref, atol=2e-3, rtol=2e-3)

    # Larger batch: 2 grid steps (both TCs on v7x), right-sized tiles
    # (tb = 304, only 8 padded rows vs. the previous 424).
    B2 = 600
    x2 = jax.random.normal(kx2, (B2, INPUT_SIZE), jnp.float32)
    out2 = jax.block_until_ready(wine_classifier_forward(x2, prep, min_steps=2))
    ref2 = reference_forward(x2, params)
    assert out2.shape == (B2, NUM_CLASSES)
    assert jnp.allclose(jnp.sum(out2, axis=1), 1.0, atol=1e-4)
    assert jnp.allclose(out2, ref2, atol=2e-3, rtol=2e-3)

    print("KERNEL_OK")
</pallas_src>

<mosaic_0001>
module attributes {stable_mosaic.version = 11 : i64} {
  func.func @wine_classifier_kernel(%arg0: i32, %arg1: memref<8x13xf32, #tpu.memory_space<vmem>>, %arg2: memref<13x128xf32, #tpu.memory_space<vmem>>, %arg3: memref<128x128xf32, #tpu.memory_space<vmem>>, %arg4: memref<128x128xf32, #tpu.memory_space<vmem>>, %arg5: memref<8x128xf32, #tpu.memory_space<vmem>>, %arg6: memref<8x128xf32, #tpu.memory_space<vmem>>) attributes {dimension_semantics = [#tpu.dimension_semantics<parallel>], iteration_bounds = array<i64: 1>, scalar_prefetch = 0 : i64, scratch_operands = 0 : i64, tpu.core_type = #tpu.core_type<tc>, window_params = [{transform_indices = @transform_0, window_bounds = array<i64: 8, 13>}, {pipeline_mode = #tpu.pipeline_mode<synchronous>, transform_indices = @transform_1, window_bounds = array<i64: 13, 128>}, {pipeline_mode = #tpu.pipeline_mode<synchronous>, transform_indices = @transform_2, window_bounds = array<i64: 128, 128>}, {pipeline_mode = #tpu.pipeline_mode<synchronous>, transform_indices = @transform_3, window_bounds = array<i64: 128, 128>}, {pipeline_mode = #tpu.pipeline_mode<synchronous>, transform_indices = @transform_4, window_bounds = array<i64: 8, 128>}, {transform_indices = @transform_5, window_bounds = array<i64: 8, 128>}]} {
    %c0 = arith.constant 0 : index
    %c0_0 = arith.constant 0 : index
    %0 = vector.load %arg1[%c0, %c0_0] : memref<8x13xf32, #tpu.memory_space<vmem>>, vector<8x13xf32>
    %c0_1 = arith.constant 0 : index
    %c0_2 = arith.constant 0 : index
    %1 = vector.load %arg5[%c0_1, %c0_2] : memref<8x128xf32, #tpu.memory_space<vmem>>, vector<1x128xf32>
    %c1 = arith.constant 1 : index
    %c0_3 = arith.constant 0 : index
    %2 = vector.load %arg5[%c1, %c0_3] : memref<8x128xf32, #tpu.memory_space<vmem>>, vector<1x128xf32>
    %c2 = arith.constant 2 : index
    %c0_4 = arith.constant 0 : index
    %3 = vector.load %arg5[%c2, %c0_4] : memref<8x128xf32, #tpu.memory_space<vmem>>, vector<1x128xf32>
    %c0_5 = arith.constant 0 : index
    %c0_6 = arith.constant 0 : index
    %4 = vector.load %arg2[%c0_5, %c0_6] : memref<13x128xf32, #tpu.memory_space<vmem>>, vector<13x128xf32>
    %cst = arith.constant dense<0.000000e+00> : vector<8x128xf32>
    %5 = tpu.matmul %0, %4, %cst {dimension_numbers = #tpu.dot_dimension_numbers<[1], [0], [0], [1], [0, 0, 1, 1], [], []>} : vector<8x13xf32>, vector<13x128xf32>, vector<8x128xf32> -> vector<8x128xf32>
    %6 = vector.broadcast %1 : vector<1x128xf32> to vector<8x128xf32>
    %7 = arith.addf %5, %6 : vector<8x128xf32>
    %cst_7 = arith.constant 0.000000e+00 : f32
    %8 = vector.broadcast %cst_7 : f32 to vector<8x128xf32>
    %9 = arith.maximumf %7, %8 : vector<8x128xf32>
    %c0_8 = arith.constant 0 : index
    %c0_9 = arith.constant 0 : index
    %10 = vector.load %arg3[%c0_8, %c0_9] : memref<128x128xf32, #tpu.memory_space<vmem>>, vector<128x128xf32>
    %cst_10 = arith.constant dense<0.000000e+00> : vector<8x128xf32>
    %11 = tpu.matmul %9, %10, %cst_10 {dimension_numbers = #tpu.dot_dimension_numbers<[1], [0], [0], [1], [0, 0, 1, 1], [], []>} : vector<8x128xf32>, vector<128x128xf32>, vector<8x128xf32> -> vector<8x128xf32>
    %12 = vector.broadcast %2 : vector<1x128xf32> to vector<8x128xf32>
    %13 = arith.addf %11, %12 : vector<8x128xf32>
    %cst_11 = arith.constant 0.000000e+00 : f32
    %14 = vector.broadcast %cst_11 : f32 to vector<8x128xf32>
    %15 = arith.maximumf %13, %14 : vector<8x128xf32>
    %c0_12 = arith.constant 0 : index
    %c0_13 = arith.constant 0 : index
    %16 = vector.load %arg4[%c0_12, %c0_13] : memref<128x128xf32, #tpu.memory_space<vmem>>, vector<128x128xf32>
    %cst_14 = arith.constant dense<0.000000e+00> : vector<8x128xf32>
    %17 = tpu.matmul %15, %16, %cst_14 {dimension_numbers = #tpu.dot_dimension_numbers<[1], [0], [0], [1], [0, 0, 1, 1], [], []>} : vector<8x128xf32>, vector<128x128xf32>, vector<8x128xf32> -> vector<8x128xf32>
    %18 = vector.broadcast %3 : vector<1x128xf32> to vector<8x128xf32>
    %19 = arith.addf %17, %18 : vector<8x128xf32>
    %cst_15 = arith.constant dense<0xFF800000> : vector<8xf32>
    %20 = vector.multi_reduction <maximumf>, %19, %cst_15 [1] : vector<8x128xf32> to vector<8xf32>
    %21 = vector.shape_cast %20 : vector<8xf32> to vector<8x1xf32>
    %22 = vector.broadcast %21 : vector<8x1xf32> to vector<8x128xf32>
    %23 = arith.subf %19, %22 : vector<8x128xf32>
    %24 = math.exp %23 : vector<8x128xf32>
    %cst_16 = arith.constant dense<0.000000e+00> : vector<8xf32>
    %25 = vector.multi_reduction <add>, %24, %cst_16 [1] : vector<8x128xf32> to vector<8xf32>
    %26 = vector.shape_cast %25 : vector<8xf32> to vector<8x1xf32>
    %27 = vector.broadcast %26 : vector<8x1xf32> to vector<8x128xf32>
    %28 = arith.divf %24, %27 : vector<8x128xf32>
    %c0_17 = arith.constant 0 : index
    %c0_18 = arith.constant 0 : index
    %29 = vector.load %arg6[%c0_17, %c0_18] : memref<8x128xf32, #tpu.memory_space<vmem>>, vector<8x128xf32>
    tpu.vector_store %arg6[%c0_17, %c0_18], %28 {strides = array<i32>} : memref<8x128xf32, #tpu.memory_space<vmem>>, vector<8x128xf32>,
    return
  }
  func.func @transform_0(%arg0: i32) -> (i32, i32) {
    %c0_i32 = arith.constant 0 : i32
    %c0_i32_0 = arith.constant 0 : i32
    return %arg0, %c0_i32 : i32, i32
  }
  func.func @transform_1(%arg0: i32) -> (i32, i32) {
    %c0_i32 = arith.constant 0 : i32
    %c0_i32_0 = arith.constant 0 : i32
    %c0_i32_1 = arith.constant 0 : i32
    return %c0_i32, %c0_i32_0 : i32, i32
  }
  func.func @transform_2(%arg0: i32) -> (i32, i32) {
    %c0_i32 = arith.constant 0 : i32
    %c0_i32_0 = arith.constant 0 : i32
    %c0_i32_1 = arith.constant 0 : i32
    return %c0_i32, %c0_i32_0 : i32, i32
  }
  func.func @transform_3(%arg0: i32) -> (i32, i32) {
    %c0_i32 = arith.constant 0 : i32
    %c0_i32_0 = arith.constant 0 : i32
    %c0_i32_1 = arith.constant 0 : i32
    return %c0_i32, %c0_i32_0 : i32, i32
  }
  func.func @transform_4(%arg0: i32) -> (i32, i32) {
    %c0_i32 = arith.constant 0 : i32
    %c0_i32_0 = arith.constant 0 : i32
    %c0_i32_1 = arith.constant 0 : i32
    return %c0_i32, %c0_i32_0 : i32, i32
  }
  func.func @transform_5(%arg0: i32) -> (i32, i32) {
    %c0_i32 = arith.constant 0 : i32
    %c0_i32_0 = arith.constant 0 : i32
    return %arg0, %c0_i32 : i32, i32
  }
}

</mosaic_0001>

<bundles_post_ra>
// kernel: tpu_custom_call.1
= control target key start
LH: loop header
LB: loop body
LE: loop exit
PB: predicated region body
PF: predicated region fallthrough
CT: control target
= control target key end

     0   :  { %10 = vsyncpa [#allocation3], 0  ;;  %s473_s0 = inlined_call_operand.hbm [shape: f32[8,13], index: 0, kind: input, shape index: {}]   ;;  %s474_s1 = inlined_call_operand.hbm [shape: f32[13,128], index: 1, kind: input, shape index: {}]   ;;  %s475_s2 = inlined_call_operand.hbm [shape: f32[128,128], index: 2, kind: input, shape index: {}]   ;;  %s476_s3 = inlined_call_operand.hbm [shape: f32[128,128], index: 3, kind: input, shape index: {}]   ;;  %s477_s4 = inlined_call_operand.hbm [shape: f32[8,128], index: 4, kind: input, shape index: {}]   ;;  %s478_s5 = inlined_call_operand.hbm [shape: f32[8,128], index: 5, kind: output, shape index: {}]  }
   0x1   :  { %11 = vsyncpa [#allocation6], 0 }
   0x2   :  { %12 = vsyncpa [#allocation9], 0  ;;  %s29_s20 = sshll.u32 %s474_s1, 4  ;;  %s30_s20 = int_to_ptr.hbm [resolvable:$true] %s29_s20 }
   0x3   :  { %13 = vsyncpa [#allocation4], 0  ;;  %s417_s21 = smov [#allocation5]   ;;  %s55_s25 = sshll.u32 %s476_s3, 4  ;;  %s56_s25 = int_to_ptr.hbm [resolvable:$true] %s55_s25 }
   0x4   :  { %s31_s22 = sshll.u32 %s417_s21, 4  ;;  %s418_s26 = smov 128   ;;  %s32_s22 = int_to_ptr.vmem [resolvable:$true] %s31_s22 }
   0x5   :  { %s419_s27 = smov 8   ;;  %s420_s28 = smov [#allocation8]  }
   0x6   :  { %37 = dma.hbm_to_vmem [thread:$0]  %s30_s20, 256, %s32_s22, [#allocation6], %s418_s26, %s418_s26, %s419_s27  }
   0x7   :  { %s57_s29 = sshll.u32 %s420_s28, 4  ;;  %s19_s7 = sshll.u32 %s473_s0, 4  ;;  %s58_s29 = int_to_ptr.vmem [resolvable:$true] %s57_s29  ;;  %s20_s7 = int_to_ptr.hbm [resolvable:$true] %s19_s7 }
   0x8   :  { %63 = dma.hbm_to_vmem [thread:$0]  %s56_s25, 2048, %s58_s29, [#allocation9], %s418_s26, %s418_s26, %s419_s27  }
   0x9   :  { %s42_s9 = sshll.u32 %s475_s2, 4  ;;  %s421_s10 = smov [#allocation2]   ;;  %s43_s9 = int_to_ptr.hbm [resolvable:$true] %s42_s9 }
   0xa   :  { %s21_s11 = sshll.u32 %s421_s10, 4  ;;  %s422_s3 = smov [#allocation7]   ;;  %s22_s11 = int_to_ptr.vmem [resolvable:$true] %s21_s11 }
   0xb   :  { %24 = dma.hbm_to_vmem [thread:$0]  %s20_s7, 128, %s22_s11, [#allocation3]  }
   0xc   :  { %s44_s12 = sshll.u32 %s422_s3, 4  ;;  %s69_s15 = sshll.u32 %s477_s4, 4  ;;  %s45_s12 = int_to_ptr.vmem [resolvable:$true] %s44_s12  ;;  %s70_s15 = int_to_ptr.hbm [resolvable:$true] %s69_s15 }
   0xd   :  { %50 = dma.hbm_to_vmem [thread:$0]  %s43_s9, 2048, %s45_s12, [#allocation6], %s418_s26, %s418_s26, %s419_s27  }
   0xe   :  { %s423_s0 = smov [#allocation10]  }
   0xf   :  { %s71_s16 = sshll.u32 %s423_s0, 4  ;;  %s72_s16 = int_to_ptr.vmem [resolvable:$true] %s71_s16 }
  0x10   :  { %74 = dma.hbm_to_vmem [thread:$0]  %s70_s15, 128, %s72_s16, [#allocation9]  }
  0x11   :  { %409 = dma.done.wait [#allocation3], 128  }
  0x12   :  { %410 = vsyncadd [#allocation3], 4294967168 }
  0x13   :  { %411 = dma.done.wait [#allocation6], 2304  }
  0x14   :  { %412 = vsyncadd [#allocation6], 4294964992 }
  0x15   :  { %413 = dma.done.wait [#allocation9], 2176  }
  0x16   :  { %414 = vsyncadd [#allocation9], 4294965120  ;;  %vm106_vm0 = vcmask 1044480   ;;  %v100_v0 = vld [vmem:[#allocation5 + $0x8] sm:$0x1f]  ;;  %v99_v1 = vld [vmem:[#allocation5] sm:$0xff] }
  0x17   :  { %248 = vmatpush.msk.msra.mxu0 %vm106_vm0, %v100_v0  ;;  %v95_v2 = vld [vmem:[#allocation2] sm:$0xff]  ;;  %vm102_vm1 = vcmask 105472   ;;  %v146_v3 = vld [vmem:[#allocation7 + $0x78] sm:$0xff]  ;;  %v145_v4 = vld [vmem:[#allocation7 + $0x70] sm:$0xff]  ;;  %s424_s2 = smov [#allocation11]   ;;  %s236_s19 = sshll.u32 %s478_s5, 4  ;;  %s237_s19 = int_to_ptr.hbm [resolvable:$true] %s236_s19 }
  0x18   :  { %148 = vmatpush.msra.mxu1 %v146_v3  ;;  %v144_v5 = vld [vmem:[#allocation7 + $0x68] sm:$0xff]  ;;  %v143_v6 = vld [vmem:[#allocation7 + $0x60] sm:$0xff]  ;;  %v142_v7 = vld [vmem:[#allocation7 + $0x58] sm:$0xff]  ;;  %s234_s4 = sshll.u32 %s424_s2, 4  ;;  %s235_s4 = int_to_ptr.vmem [resolvable:$true] %s234_s4 }
  0x19   :  { %125 = vmatpush.msra.mxu0 %v99_v1  ;;  %v141_v8 = vld [vmem:[#allocation7 + $0x50] sm:$0xff]  ;;  %v140_v9 = vld [vmem:[#allocation7 + $0x48] sm:$0xff]  ;;  %v139_v10 = vld [vmem:[#allocation7 + $0x40] sm:$0xff] }
  0x1a   :  { %249 = vmatmul.msk.f32.vlgmr.msra.gmra.mxu0 %vm102_vm1, %v95_v2  ;;  %149 = vmatpush.msra.mxu1 %v145_v4  ;;  %v138_v11 = vld [vmem:[#allocation7 + $0x38] sm:$0xff]  ;;  %v137_v12 = vld [vmem:[#allocation7 + $0x30] sm:$0xff]  ;;  %v136_v13 = vld [vmem:[#allocation7 + $0x28] sm:$0xff] }
  0x1b   :  { %v135_v14 = vld [vmem:[#allocation7 + $0x20] sm:$0xff]  ;;  %v134_v15 = vld [vmem:[#allocation7 + $0x18] sm:$0xff]  ;;  %v133_v16 = vld [vmem:[#allocation7 + $0x10] sm:$0xff] }
  0x1c   :  { %150 = vmatpush.msra.mxu1 %v144_v5  ;;  %v132_v17 = vld [vmem:[#allocation7 + $0x8] sm:$0xff]  ;;  %v131_v18 = vld [vmem:[#allocation7] sm:$0xff]  ;;  %v184_v19 = vld [vmem:[#allocation8 + $0x78] sm:$0xff] }
  0x1d   :  { %v183_v20 = vld [vmem:[#allocation8 + $0x70] sm:$0xff]  ;;  %186 = vmatpush.msra.mxu2 %v184_v19  ;;  %v182_v21 = vld [vmem:[#allocation8 + $0x68] sm:$0xff]  ;;  %v181_v22 = vld [vmem:[#allocation8 + $0x60] sm:$0xff] }
  0x1e   :  { %151 = vmatpush.msra.mxu1 %v143_v6  ;;  %v180_v23 = vld [vmem:[#allocation8 + $0x58] sm:$0xff]  ;;  %v179_v24 = vld [vmem:[#allocation8 + $0x50] sm:$0xff]  ;;  %v178_v25 = vld [vmem:[#allocation8 + $0x48] sm:$0xff] }
  0x1f   :  { %187 = vmatpush.msra.mxu2 %v183_v20  ;;  %v177_v26 = vld [vmem:[#allocation8 + $0x40] sm:$0xff]  ;;  %v176_v27 = vld [vmem:[#allocation8 + $0x38] sm:$0xff]  ;;  %v175_v28 = vld [vmem:[#allocation8 + $0x30] sm:$0xff] }
  0x20   :  { %152 = vmatpush.msra.mxu1 %v142_v7  ;;  %v174_v29 = vld [vmem:[#allocation8 + $0x28] sm:$0xff]  ;;  %v173_v30 = vld [vmem:[#allocation8 + $0x20] sm:$0xff]  ;;  %v172_v31 = vld [vmem:[#allocation8 + $0x18] sm:$0xff] }
  0x21   :  { %188 = vmatpush.msra.mxu2 %v182_v21  ;;  %v258_v32 = vld [vmem:[#allocation10] ss:$0 sm:$0xff]  ;;  %v171_v36 = vld [vmem:[#allocation8 + $0x10] sm:$0xff]  ;;  %v170_v37 = vld [vmem:[#allocation8 + $0x8] sm:$0xff] }
  0x22   :  { %153 = vmatpush.msra.mxu1 %v141_v8  ;;  %v169_v38 = vld [vmem:[#allocation8] sm:$0xff] }
  0x23   :  { %189 = vmatpush.msra.mxu2 %v181_v22  ;;  %v259_v39 = vld [vmem:[#allocation10 + $0x1] ss:$0 sm:$0xff]  ;;  %v260_v43 = vld [vmem:[#allocation10 + $0x2] ss:$0 sm:$0xff] }
  0x24   :  { %154 = vmatpush.msra.mxu1 %v140_v9 }
  0x25   :  { %190 = vmatpush.msra.mxu2 %v180_v23 }
  0x26   :  { %155 = vmatpush.msra.mxu1 %v139_v10 }
  0x27   :  { %191 = vmatpush.msra.mxu2 %v179_v24 }
  0x28   :  { %156 = vmatpush.msra.mxu1 %v138_v11 }
  0x29   :  { %192 = vmatpush.msra.mxu2 %v178_v25 }
  0x2a   :  { %157 = vmatpush.msra.mxu1 %v137_v12 }
  0x2b   :  { %193 = vmatpush.msra.mxu2 %v177_v26 }
  0x2c   :  { %158 = vmatpush.msra.mxu1 %v136_v13 }
  0x2d   :  { %194 = vmatpush.msra.mxu2 %v176_v27 }
  0x2e   :  { %159 = vmatpush.msra.mxu1 %v135_v14 }
  0x2f   :  { %195 = vmatpush.msra.mxu2 %v175_v28 }
  0x30   :  { %160 = vmatpush.msra.mxu1 %v134_v15 }
  0x31   :  { %196 = vmatpush.msra.mxu2 %v174_v29 }
  0x32   :  { %161 = vmatpush.msra.mxu1 %v133_v16 }
  0x33   :  { %197 = vmatpush.msra.mxu2 %v173_v30 }
  0x34   :  { %162 = vmatpush.msra.mxu1 %v132_v17 }
  0x35   :  { %198 = vmatpush.msra.mxu2 %v172_v31 }
  0x36   :  { %163 = vmatpush.msra.mxu1 %v131_v18 }
  0x37   :  { %199 = vmatpush.msra.mxu2 %v171_v36 }
  0x39   :  { %200 = vmatpush.msra.mxu2 %v170_v37 }
  0x3b   :  { %201 = vmatpush.msra.mxu2 %v169_v38 }
  0x97   :  { %v127_v33 = vpop.f32.mrf.mxu0 }
  0x98   :  { %v128_v34 = vadd.f32 %v258_v32, %v127_v33 }
  0x9a   :  { %v130_v35 = vmax.f32 %v128_v34, 0.0 }
  0x9c   :  { %164 = vmatmul.f32.vlgmr.msra.gmra.mxu1 %v130_v35 }
 0x119   :  { %v165_v40 = vpop.f32.mrf.mxu1 }
 0x11a   :  { %v166_v41 = vadd.f32 %v259_v39, %v165_v40 }
 0x11c   :  { %v168_v42 = vmax.f32 %v166_v41, 0.0 }
 0x11e   :  { %202 = vmatmul.f32.vlgmr.msra.gmra.mxu2 %v168_v42 }
 0x1a1   :  { %v203_v44 = vpop.f32.mrf.mxu2 }
 0x1a2   :  { %v204_v45 = vadd.f32 %v260_v43, %v203_v44 }
 0x1a4   :  { %206 = vmax.xlane.f32.xlu0 %v204_v45 }
 0x217   :  { %v207_v46 = vpop.xlane.xlu0 %206 }
 0x218   :  { %v208_v47 = vsub.f32 %v204_v45, %v207_v46 }
 0x21a   :  { %v209_v48 = vmul.f32 1.442695, %v208_v47 }
 0x21c   :  { %261 = vpow2.f32 %v209_v48 }
 0x222   :  { %v262_v49 = vpop.eup %261 }
 0x223   :  { %211 = vadd.xlane.f32.xlu0 %v262_v49 }
 0x296   :  { %v212_v50 = vpop.xlane.xlu0 %211 }
 0x297   :  { %263 = vrcp.f32 %v212_v50  ;;  %v224_v54 = vand.u32 2147483648, %v212_v50  ;;  %v222_v56 = vand.u32 2147483647, %v212_v50  ;;  %vm218_vm3 = vweird.f32 %v212_v50 }
 0x299   :  { %v225_v58 = vor.u32 1.1754944e-38, %v224_v54  ;;  %vm223_vm5 = vcmp.eq.f32.partialorder %v222_v56, 8.507059e+37 }
 0x29d   :  { %v264_v51 = vpop.eup %263 }
 0x29e   :  { %v214_v52 = vmul.f32 %v264_v51, %v212_v50  ;;  %vm219_vm2 = vweird.f32 %v264_v51 }
 0x29f   :  { %vm220_vm4 = vmor %vm218_vm3, %vm219_vm2 }
 0x2a0   :  { %v215_v53 = vsub.f32 1.0, %v214_v52 }
 0x2a2   :  { %v216_v55 = vmul.f32 %v264_v51, %v215_v53 }
 0x2a4   :  { %v217_v57 = vadd.f32 %v264_v51, %v216_v55 }
 0x2a6   :  { %v221_v59 = vsel %vm220_vm4, %v264_v51, %v217_v57 }
 0x2a7   :  { %v226_v60 = vsel %vm223_vm5, %v225_v58, %v221_v59 }
 0x2a8   :  { %v227_v61 = vmul.f32 %v262_v49, %v226_v60 }
 0x2aa   :  { %228 = vst [vmem:[#allocation11] sm:$0xff] %v227_v61 }
 0x2ab   :  { %239 = dma.vmem_to_hbm [thread:$0]  %s235_s4, 128, %s237_s19, [#allocation4]  }
 0x2ac   :  { %415 = dma.done.wait [#allocation4], 128  }
 0x2ad   :  { %416 = vsyncadd [#allocation4], 4294967168 }
 0x2ae   :  { %244 = vsyncpa [#allocation3], 1 }
 0x2af   :  { %245 = vsyncpa [#allocation6], 1 }
 0x2b0   :  { %246 = vsyncpa [#allocation9], 1 }
 0x2b1   :  { %247 = vsyncpa [#allocation4], 1 }

</bundles_post_ra>
